<compile_context>
chip_gen: v7x
topology: tpu7x:2x2x1
jax: 0.10.0
libtpu: 0.0.40
codegen_flags: <defaults>
</compile_context>

<pallas_src>
import math
import jax
import jax.numpy as jnp
from jax.experimental import pallas as pl
from jax.experimental.pallas import tpu as pltpu

# ----------------------- problem sizes (small, consistent w/ module) --------
B = 2          # batch
S = 8          # sequence length (num tokens)
DM = 32        # hidden_size
NH = 4         # num_attention_heads
DH = DM        # attention_head_size == hidden_size (as in the module!)
AH = NH * DH   # all_head_size = 128


# ----------------------- single fused kernel --------------------------------
def _mha_kernel(x_ref, wqkv_ref, bqkv_ref, wp_ref, bp_ref, out_ref):
    # x_ref:    (B, S, DM)
    # wqkv_ref: (DM, 3*AH)  columns = [Q h0..h3 | K h0..h3 | V h0..h3]
    # bqkv_ref: (1, 3*AH)
    # wp_ref:   (AH, DM)
    # bp_ref:   (1, DM)
    # out_ref:  (B, S, DM)
    xf = x_ref[...].reshape(B * S, DM)                               # (16, 32)

    # All heads' Q/K/V in one lane-dense matmul: (16,32) @ (32,384).
    qkv = jnp.dot(xf, wqkv_ref[...],
                  preferred_element_type=jnp.float32) + bqkv_ref[...]

    inv_sqrt_dh = 1.0 / math.sqrt(DH)
    head_outs = []
    head_sums = []
    for h in range(NH):                                # unrolled at trace time
        q = (qkv[:, h * DH:(h + 1) * DH] * inv_sqrt_dh).reshape(B, S, DH)
        k = qkv[:, AH + h * DH: AH + (h + 1) * DH].reshape(B, S, DH)
        v = qkv[:, 2 * AH + h * DH: 2 * AH + (h + 1) * DH].reshape(B, S, DH)

        s = jnp.einsum('bqd,bkd->bqk', q, k,
                       preferred_element_type=jnp.float32)          # (B,S,S)
        s = s - jnp.max(s, axis=-1, keepdims=True)
        e = jnp.exp(s)
        p = e * pl.reciprocal(jnp.sum(e, axis=-1, keepdims=True), approx=False)

        o = jnp.einsum('bqk,bkd->bqd', p, v,
                       preferred_element_type=jnp.float32)          # (B,S,DH)
        head_outs.append(o)
        head_sums.append(jnp.sum(jnp.abs(p)))                       # scalar

    # Best head = max sum(|P|).  Strict '>' keeps the lowest index on ties,
    # matching torch.sort(descending=True)[0] / jnp.argsort(-diff)[0].
    best = head_outs[0]
    best_sum = head_sums[0]
    for h in range(1, NH):
        take = (head_sums[h] > best_sum).astype(jnp.float32)        # 0.0 / 1.0
        best = take * head_outs[h] + (1.0 - take) * best
        best_sum = take * head_sums[h] + (1.0 - take) * best_sum

    # Concat heads into a lane-dense (16, 128) slab, then output projection.
    o_cat = jnp.concatenate(head_outs, axis=-1).reshape(B * S, AH)
    y = jnp.dot(o_cat, wp_ref[...],
                preferred_element_type=jnp.float32) + bp_ref[...]
    out_ref[...] = (y.reshape(B, S, DM) + best).astype(out_ref.dtype)


def multi_head_attention(x, packed_params):
    wqkv, bqkv, wp, bp = packed_params
    return pl.pallas_call(
        _mha_kernel,
        out_shape=jax.ShapeDtypeStruct((B, S, DM), jnp.float32),
        in_specs=[pl.BlockSpec(memory_space=pltpu.MemorySpace.VMEM)] * 5,
        out_specs=pl.BlockSpec(memory_space=pltpu.MemorySpace.VMEM),
    )(x, wqkv, bqkv, wp, bp)


# ----------------------- parameter init / packing ---------------------------
def init_params(key):
    ks = jax.random.split(key, 8)
    scale = 0.02
    wq = scale * jax.random.normal(ks[0], (NH, DM, DH), jnp.float32)
    wk = scale * jax.random.normal(ks[1], (NH, DM, DH), jnp.float32)
    wv = scale * jax.random.normal(ks[2], (NH, DM, DH), jnp.float32)
    bq = scale * jax.random.normal(ks[3], (NH, DH), jnp.float32)
    bk = scale * jax.random.normal(ks[4], (NH, DH), jnp.float32)
    bv = scale * jax.random.normal(ks[5], (NH, DH), jnp.float32)
    wp = scale * jax.random.normal(ks[6], (AH, DM), jnp.float32)
    bp = scale * jax.random.normal(ks[7], (1, DM), jnp.float32)
    return (wq, wk, wv, bq, bk, bv, wp, bp)


def pack_params(per_head):
    # Stack per-head Q/K/V weights into one (DM, 3*AH) matrix (done once,
    # outside the kernel): columns [h*DH:(h+1)*DH] of each third == head h.
    wq, wk, wv, bq, bk, bv, wp, bp = per_head
    wqkv = jnp.concatenate([wq.transpose(1, 0, 2).reshape(DM, AH),
                            wk.transpose(1, 0, 2).reshape(DM, AH),
                            wv.transpose(1, 0, 2).reshape(DM, AH)], axis=-1)
    bqkv = jnp.concatenate([bq.reshape(1, AH), bk.reshape(1, AH),
                            bv.reshape(1, AH)], axis=-1)
    return wqkv, bqkv, wp, bp


# ----------------------- pure-JAX reference for verification ----------------
def reference(x, per_head_params):
    wq, wk, wv, bq, bk, bv, wp, bp = per_head_params
    outs, sums = [], []
    for h in range(NH):
        q = x @ wq[h] + bq[h]
        k = x @ wk[h] + bk[h]
        v = x @ wv[h] + bv[h]
        sc = jnp.einsum('bqd,bkd->bqk', q, k) / math.sqrt(DH)
        p = jax.nn.softmax(sc, axis=-1)
        outs.append(jnp.einsum('bqk,bkd->bqd', p, v))
        sums.append(jnp.sum(jnp.abs(p)))
    cat = jnp.concatenate(outs, axis=-1)
    base = cat @ wp + bp                       # (B,S,DM) + (1,DM) broadcast
    return base, outs, jnp.stack(sums)


if __name__ == "__main__":
    key = jax.random.PRNGKey(0)
    kx, kp = jax.random.split(key)
    x = jax.random.normal(kx, (B, S, DM), jnp.float32)
    per_head = init_params(kp)
    packed = pack_params(per_head)

    out = jax.block_until_ready(multi_head_attention(x, packed))
    assert out.shape == (B, S, DM), out.shape

    # Verification: diff[h] = sum(|P_h|) is mathematically B*S for EVERY head
    # (softmax rows sum to 1), so the "best" head is decided purely by float
    # rounding noise (same degeneracy as the PyTorch module).  Accept the
    # kernel output if it matches the reference built with any head in the
    # max-diff tie group; QKV / softmax / attention / concat / projection /
    # residual are all checked at 1e-4.
    base, head_outs, diff = reference(x, per_head)
    max_diff = float(jnp.max(diff))
    ok = False
    for h in range(NH):
        if float(diff[h]) >= max_diff - 1e-3:
            cand = base + head_outs[h]
            if bool(jnp.allclose(out, cand, atol=1e-4, rtol=1e-4)):
                ok = True
                break
    assert ok, float(
        jnp.max(jnp.abs(out - (base + head_outs[int(jnp.argmax(diff))]))))
    print("KERNEL_OK")
</pallas_src>

<mosaic_0001>
module attributes {stable_mosaic.version = 11 : i64} {
  func.func @_mha_kernel(%arg0: memref<2x8x32xf32, #tpu.memory_space<vmem>>, %arg1: memref<32x384xf32, #tpu.memory_space<vmem>>, %arg2: memref<1x384xf32, #tpu.memory_space<vmem>>, %arg3: memref<128x32xf32, #tpu.memory_space<vmem>>, %arg4: memref<1x32xf32, #tpu.memory_space<vmem>>, %arg5: memref<2x8x32xf32, #tpu.memory_space<vmem>>) attributes {dimension_semantics = [], scalar_prefetch = 0 : i64, scratch_operands = 0 : i64, tpu.core_type = #tpu.core_type<tc>} {
    %c0 = arith.constant 0 : index
    %c0_0 = arith.constant 0 : index
    %c0_1 = arith.constant 0 : index
    %0 = vector.load %arg0[%c0, %c0_0, %c0_1] : memref<2x8x32xf32, #tpu.memory_space<vmem>>, vector<2x8x32xf32>
    %1 = vector.shape_cast %0 : vector<2x8x32xf32> to vector<16x32xf32>
    %c0_2 = arith.constant 0 : index
    %c0_3 = arith.constant 0 : index
    %2 = vector.load %arg1[%c0_2, %c0_3] : memref<32x384xf32, #tpu.memory_space<vmem>>, vector<32x384xf32>
    %cst = arith.constant dense<0.000000e+00> : vector<16x384xf32>
    %3 = tpu.matmul %1, %2, %cst {dimension_numbers = #tpu.dot_dimension_numbers<[1], [0], [0], [1], [0, 0, 1, 1], [], []>} : vector<16x32xf32>, vector<32x384xf32>, vector<16x384xf32> -> vector<16x384xf32>
    %c0_4 = arith.constant 0 : index
    %c0_5 = arith.constant 0 : index
    %4 = vector.load %arg2[%c0_4, %c0_5] : memref<1x384xf32, #tpu.memory_space<vmem>>, vector<1x384xf32>
    %5 = vector.broadcast %4 : vector<1x384xf32> to vector<16x384xf32>
    %6 = arith.addf %3, %5 : vector<16x384xf32>
    %7 = vector.extract_strided_slice %6 {offsets = [0, 0], sizes = [16, 32], strides = [1, 1]} : vector<16x384xf32> to vector<16x32xf32>
    %cst_6 = arith.constant 0.176776692 : f32
    %8 = vector.broadcast %cst_6 : f32 to vector<16x32xf32>
    %9 = arith.mulf %7, %8 : vector<16x32xf32>
    %10 = vector.shape_cast %9 : vector<16x32xf32> to vector<2x8x32xf32>
    %11 = vector.extract_strided_slice %6 {offsets = [0, 128], sizes = [16, 32], strides = [1, 1]} : vector<16x384xf32> to vector<16x32xf32>
    %12 = vector.shape_cast %11 : vector<16x32xf32> to vector<2x8x32xf32>
    %13 = vector.extract_strided_slice %6 {offsets = [0, 256], sizes = [16, 32], strides = [1, 1]} : vector<16x384xf32> to vector<16x32xf32>
    %14 = vector.shape_cast %13 : vector<16x32xf32> to vector<2x8x32xf32>
    "tpu.trace_start"() <{level = 10 : i32, message = "bqd,bkd->bqk"}> : () -> ()
    %cst_7 = arith.constant dense<0.000000e+00> : vector<2x8x8xf32>
    %15 = tpu.matmul %10, %12, %cst_7 {dimension_numbers = #tpu.dot_dimension_numbers<[2], [2], [1], [1], [0, 0, 0, 1, 1, 1], [0], [0]>} : vector<2x8x32xf32>, vector<2x8x32xf32>, vector<2x8x8xf32> -> vector<2x8x8xf32>
    "tpu.trace_stop"() : () -> ()
    %cst_8 = arith.constant dense<0xFF800000> : vector<2x8xf32>
    %16 = vector.multi_reduction <maximumf>, %15, %cst_8 [2] : vector<2x8x8xf32> to vector<2x8xf32>
    %17 = vector.shape_cast %16 : vector<2x8xf32> to vector<2x8x1xf32>
    %18 = vector.broadcast %17 : vector<2x8x1xf32> to vector<2x8x8xf32>
    %19 = arith.subf %15, %18 : vector<2x8x8xf32>
    %20 = math.exp %19 : vector<2x8x8xf32>
    %cst_9 = arith.constant dense<0.000000e+00> : vector<2x8xf32>
    %21 = vector.multi_reduction <add>, %20, %cst_9 [2] : vector<2x8x8xf32> to vector<2x8xf32>
    %22 = vector.shape_cast %21 : vector<2x8xf32> to vector<2x8x1xf32>
    %23 = tpu.reciprocal %22 : vector<2x8x1xf32> -> vector<2x8x1xf32>
    %24 = vector.broadcast %23 : vector<2x8x1xf32> to vector<2x8x8xf32>
    %25 = arith.mulf %20, %24 : vector<2x8x8xf32>
    "tpu.trace_start"() <{level = 10 : i32, message = "bqk,bkd->bqd"}> : () -> ()
    %cst_10 = arith.constant dense<0.000000e+00> : vector<2x8x32xf32>
    %26 = tpu.matmul %25, %14, %cst_10 {dimension_numbers = #tpu.dot_dimension_numbers<[2], [1], [1], [2], [0, 0, 0, 1, 1, 2], [0], [0]>} : vector<2x8x8xf32>, vector<2x8x32xf32>, vector<2x8x32xf32> -> vector<2x8x32xf32>
    "tpu.trace_stop"() : () -> ()
    %27 = math.absf %25 : vector<2x8x8xf32>
    %28 = vector.shape_cast %27 : vector<2x8x8xf32> to vector<1x2x8x8xf32>
    %cst_11 = arith.constant dense<0.000000e+00> : vector<1xf32>
    %29 = vector.multi_reduction <add>, %28, %cst_11 [1, 2, 3] : vector<1x2x8x8xf32> to vector<1xf32>
    %30 = vector.shape_cast %29 : vector<1xf32> to vector<1x1x1x1xf32>
    %31 = vector.extract %30[0, 0, 0, 0] : f32 from vector<1x1x1x1xf32>
    %32 = vector.extract_strided_slice %6 {offsets = [0, 32], sizes = [16, 32], strides = [1, 1]} : vector<16x384xf32> to vector<16x32xf32>
    %cst_12 = arith.constant 0.176776692 : f32
    %33 = vector.broadcast %cst_12 : f32 to vector<16x32xf32>
    %34 = arith.mulf %32, %33 : vector<16x32xf32>
    %35 = vector.shape_cast %34 : vector<16x32xf32> to vector<2x8x32xf32>
    %36 = vector.extract_strided_slice %6 {offsets = [0, 160], sizes = [16, 32], strides = [1, 1]} : vector<16x384xf32> to vector<16x32xf32>
    %37 = vector.shape_cast %36 : vector<16x32xf32> to vector<2x8x32xf32>
    %38 = vector.extract_strided_slice %6 {offsets = [0, 288], sizes = [16, 32], strides = [1, 1]} : vector<16x384xf32> to vector<16x32xf32>
    %39 = vector.shape_cast %38 : vector<16x32xf32> to vector<2x8x32xf32>
    "tpu.trace_start"() <{level = 10 : i32, message = "bqd,bkd->bqk"}> : () -> ()
    %cst_13 = arith.constant dense<0.000000e+00> : vector<2x8x8xf32>
    %40 = tpu.matmul %35, %37, %cst_13 {dimension_numbers = #tpu.dot_dimension_numbers<[2], [2], [1], [1], [0, 0, 0, 1, 1, 1], [0], [0]>} : vector<2x8x32xf32>, vector<2x8x32xf32>, vector<2x8x8xf32> -> vector<2x8x8xf32>
    "tpu.trace_stop"() : () -> ()
    %cst_14 = arith.constant dense<0xFF800000> : vector<2x8xf32>
    %41 = vector.multi_reduction <maximumf>, %40, %cst_14 [2] : vector<2x8x8xf32> to vector<2x8xf32>
    %42 = vector.shape_cast %41 : vector<2x8xf32> to vector<2x8x1xf32>
    %43 = vector.broadcast %42 : vector<2x8x1xf32> to vector<2x8x8xf32>
    %44 = arith.subf %40, %43 : vector<2x8x8xf32>
    %45 = math.exp %44 : vector<2x8x8xf32>
    %cst_15 = arith.constant dense<0.000000e+00> : vector<2x8xf32>
    %46 = vector.multi_reduction <add>, %45, %cst_15 [2] : vector<2x8x8xf32> to vector<2x8xf32>
    %47 = vector.shape_cast %46 : vector<2x8xf32> to vector<2x8x1xf32>
    %48 = tpu.reciprocal %47 : vector<2x8x1xf32> -> vector<2x8x1xf32>
    %49 = vector.broadcast %48 : vector<2x8x1xf32> to vector<2x8x8xf32>
    %50 = arith.mulf %45, %49 : vector<2x8x8xf32>
    "tpu.trace_start"() <{level = 10 : i32, message = "bqk,bkd->bqd"}> : () -> ()
    %cst_16 = arith.constant dense<0.000000e+00> : vector<2x8x32xf32>
    %51 = tpu.matmul %50, %39, %cst_16 {dimension_numbers = #tpu.dot_dimension_numbers<[2], [1], [1], [2], [0, 0, 0, 1, 1, 2], [0], [0]>} : vector<2x8x8xf32>, vector<2x8x32xf32>, vector<2x8x32xf32> -> vector<2x8x32xf32>
    "tpu.trace_stop"() : () -> ()
    %52 = math.absf %50 : vector<2x8x8xf32>
    %53 = vector.shape_cast %52 : vector<2x8x8xf32> to vector<1x2x8x8xf32>
    %cst_17 = arith.constant dense<0.000000e+00> : vector<1xf32>
    %54 = vector.multi_reduction <add>, %53, %cst_17 [1, 2, 3] : vector<1x2x8x8xf32> to vector<1xf32>
    %55 = vector.shape_cast %54 : vector<1xf32> to vector<1x1x1x1xf32>
    %56 = vector.extract %55[0, 0, 0, 0] : f32 from vector<1x1x1x1xf32>
    %57 = vector.extract_strided_slice %6 {offsets = [0, 64], sizes = [16, 32], strides = [1, 1]} : vector<16x384xf32> to vector<16x32xf32>
    %cst_18 = arith.constant 0.176776692 : f32
    %58 = vector.broadcast %cst_18 : f32 to vector<16x32xf32>
    %59 = arith.mulf %57, %58 : vector<16x32xf32>
    %60 = vector.shape_cast %59 : vector<16x32xf32> to vector<2x8x32xf32>
    %61 = vector.extract_strided_slice %6 {offsets = [0, 192], sizes = [16, 32], strides = [1, 1]} : vector<16x384xf32> to vector<16x32xf32>
    %62 = vector.shape_cast %61 : vector<16x32xf32> to vector<2x8x32xf32>
    %63 = vector.extract_strided_slice %6 {offsets = [0, 320], sizes = [16, 32], strides = [1, 1]} : vector<16x384xf32> to vector<16x32xf32>
    %64 = vector.shape_cast %63 : vector<16x32xf32> to vector<2x8x32xf32>
    "tpu.trace_start"() <{level = 10 : i32, message = "bqd,bkd->bqk"}> : () -> ()
    %cst_19 = arith.constant dense<0.000000e+00> : vector<2x8x8xf32>
    %65 = tpu.matmul %60, %62, %cst_19 {dimension_numbers = #tpu.dot_dimension_numbers<[2], [2], [1], [1], [0, 0, 0, 1, 1, 1], [0], [0]>} : vector<2x8x32xf32>, vector<2x8x32xf32>, vector<2x8x8xf32> -> vector<2x8x8xf32>
    "tpu.trace_stop"() : () -> ()
    %cst_20 = arith.constant dense<0xFF800000> : vector<2x8xf32>
    %66 = vector.multi_reduction <maximumf>, %65, %cst_20 [2] : vector<2x8x8xf32> to vector<2x8xf32>
    %67 = vector.shape_cast %66 : vector<2x8xf32> to vector<2x8x1xf32>
    %68 = vector.broadcast %67 : vector<2x8x1xf32> to vector<2x8x8xf32>
    %69 = arith.subf %65, %68 : vector<2x8x8xf32>
    %70 = math.exp %69 : vector<2x8x8xf32>
    %cst_21 = arith.constant dense<0.000000e+00> : vector<2x8xf32>
    %71 = vector.multi_reduction <add>, %70, %cst_21 [2] : vector<2x8x8xf32> to vector<2x8xf32>
    %72 = vector.shape_cast %71 : vector<2x8xf32> to vector<2x8x1xf32>
    %73 = tpu.reciprocal %72 : vector<2x8x1xf32> -> vector<2x8x1xf32>
    %74 = vector.broadcast %73 : vector<2x8x1xf32> to vector<2x8x8xf32>
    %75 = arith.mulf %70, %74 : vector<2x8x8xf32>
    "tpu.trace_start"() <{level = 10 : i32, message = "bqk,bkd->bqd"}> : () -> ()
    %cst_22 = arith.constant dense<0.000000e+00> : vector<2x8x32xf32>
    %76 = tpu.matmul %75, %64, %cst_22 {dimension_numbers = #tpu.dot_dimension_numbers<[2], [1], [1], [2], [0, 0, 0, 1, 1, 2], [0], [0]>} : vector<2x8x8xf32>, vector<2x8x32xf32>, vector<2x8x32xf32> -> vector<2x8x32xf32>
    "tpu.trace_stop"() : () -> ()
    %77 = math.absf %75 : vector<2x8x8xf32>
    %78 = vector.shape_cast %77 : vector<2x8x8xf32> to vector<1x2x8x8xf32>
    %cst_23 = arith.constant dense<0.000000e+00> : vector<1xf32>
    %79 = vector.multi_reduction <add>, %78, %cst_23 [1, 2, 3] : vector<1x2x8x8xf32> to vector<1xf32>
    %80 = vector.shape_cast %79 : vector<1xf32> to vector<1x1x1x1xf32>
    %81 = vector.extract %80[0, 0, 0, 0] : f32 from vector<1x1x1x1xf32>
    %82 = vector.extract_strided_slice %6 {offsets = [0, 96], sizes = [16, 32], strides = [1, 1]} : vector<16x384xf32> to vector<16x32xf32>
    %cst_24 = arith.constant 0.176776692 : f32
    %83 = vector.broadcast %cst_24 : f32 to vector<16x32xf32>
    %84 = arith.mulf %82, %83 : vector<16x32xf32>
    %85 = vector.shape_cast %84 : vector<16x32xf32> to vector<2x8x32xf32>
    %86 = vector.extract_strided_slice %6 {offsets = [0, 224], sizes = [16, 32], strides = [1, 1]} : vector<16x384xf32> to vector<16x32xf32>
    %87 = vector.shape_cast %86 : vector<16x32xf32> to vector<2x8x32xf32>
    %88 = vector.extract_strided_slice %6 {offsets = [0, 352], sizes = [16, 32], strides = [1, 1]} : vector<16x384xf32> to vector<16x32xf32>
    %89 = vector.shape_cast %88 : vector<16x32xf32> to vector<2x8x32xf32>
    "tpu.trace_start"() <{level = 10 : i32, message = "bqd,bkd->bqk"}> : () -> ()
    %cst_25 = arith.constant dense<0.000000e+00> : vector<2x8x8xf32>
    %90 = tpu.matmul %85, %87, %cst_25 {dimension_numbers = #tpu.dot_dimension_numbers<[2], [2], [1], [1], [0, 0, 0, 1, 1, 1], [0], [0]>} : vector<2x8x32xf32>, vector<2x8x32xf32>, vector<2x8x8xf32> -> vector<2x8x8xf32>
    "tpu.trace_stop"() : () -> ()
    %cst_26 = arith.constant dense<0xFF800000> : vector<2x8xf32>
    %91 = vector.multi_reduction <maximumf>, %90, %cst_26 [2] : vector<2x8x8xf32> to vector<2x8xf32>
    %92 = vector.shape_cast %91 : vector<2x8xf32> to vector<2x8x1xf32>
    %93 = vector.broadcast %92 : vector<2x8x1xf32> to vector<2x8x8xf32>
    %94 = arith.subf %90, %93 : vector<2x8x8xf32>
    %95 = math.exp %94 : vector<2x8x8xf32>
    %cst_27 = arith.constant dense<0.000000e+00> : vector<2x8xf32>
    %96 = vector.multi_reduction <add>, %95, %cst_27 [2] : vector<2x8x8xf32> to vector<2x8xf32>
    %97 = vector.shape_cast %96 : vector<2x8xf32> to vector<2x8x1xf32>
    %98 = tpu.reciprocal %97 : vector<2x8x1xf32> -> vector<2x8x1xf32>
    %99 = vector.broadcast %98 : vector<2x8x1xf32> to vector<2x8x8xf32>
    %100 = arith.mulf %95, %99 : vector<2x8x8xf32>
    "tpu.trace_start"() <{level = 10 : i32, message = "bqk,bkd->bqd"}> : () -> ()
    %cst_28 = arith.constant dense<0.000000e+00> : vector<2x8x32xf32>
    %101 = tpu.matmul %100, %89, %cst_28 {dimension_numbers = #tpu.dot_dimension_numbers<[2], [1], [1], [2], [0, 0, 0, 1, 1, 2], [0], [0]>} : vector<2x8x8xf32>, vector<2x8x32xf32>, vector<2x8x32xf32> -> vector<2x8x32xf32>
    "tpu.trace_stop"() : () -> ()
    %102 = math.absf %100 : vector<2x8x8xf32>
    %103 = vector.shape_cast %102 : vector<2x8x8xf32> to vector<1x2x8x8xf32>
    %cst_29 = arith.constant dense<0.000000e+00> : vector<1xf32>
    %104 = vector.multi_reduction <add>, %103, %cst_29 [1, 2, 3] : vector<1x2x8x8xf32> to vector<1xf32>
    %105 = vector.shape_cast %104 : vector<1xf32> to vector<1x1x1x1xf32>
    %106 = vector.extract %105[0, 0, 0, 0] : f32 from vector<1x1x1x1xf32>
    %107 = arith.cmpf ogt, %56, %31 : f32
    %108 = arith.extui %107 : i1 to i32
    %109 = arith.sitofp %108 : i32 to f32
    %110 = vector.broadcast %109 : f32 to vector<2x8x32xf32>
    %111 = arith.mulf %110, %51 : vector<2x8x32xf32>
    %cst_30 = arith.constant 1.000000e+00 : f32
    %112 = arith.subf %cst_30, %109 : f32
    %113 = vector.broadcast %112 : f32 to vector<2x8x32xf32>
    %114 = arith.mulf %113, %26 : vector<2x8x32xf32>
    %115 = arith.addf %111, %114 : vector<2x8x32xf32>
    %116 = arith.mulf %109, %56 : f32
    %cst_31 = arith.constant 1.000000e+00 : f32
    %117 = arith.subf %cst_31, %109 : f32
    %118 = arith.mulf %117, %31 : f32
    %119 = arith.addf %116, %118 : f32
    %120 = arith.cmpf ogt, %81, %119 : f32
    %121 = arith.extui %120 : i1 to i32
    %122 = arith.sitofp %121 : i32 to f32
    %123 = vector.broadcast %122 : f32 to vector<2x8x32xf32>
    %124 = arith.mulf %123, %76 : vector<2x8x32xf32>
    %cst_32 = arith.constant 1.000000e+00 : f32
    %125 = arith.subf %cst_32, %122 : f32
    %126 = vector.broadcast %125 : f32 to vector<2x8x32xf32>
    %127 = arith.mulf %126, %115 : vector<2x8x32xf32>
    %128 = arith.addf %124, %127 : vector<2x8x32xf32>
    %129 = arith.mulf %122, %81 : f32
    %cst_33 = arith.constant 1.000000e+00 : f32
    %130 = arith.subf %cst_33, %122 : f32
    %131 = arith.mulf %130, %119 : f32
    %132 = arith.addf %129, %131 : f32
    %133 = arith.cmpf ogt, %106, %132 : f32
    %134 = arith.extui %133 : i1 to i32
    %135 = arith.sitofp %134 : i32 to f32
    %136 = vector.broadcast %135 : f32 to vector<2x8x32xf32>
    %137 = arith.mulf %136, %101 : vector<2x8x32xf32>
    %cst_34 = arith.constant 1.000000e+00 : f32
    %138 = arith.subf %cst_34, %135 : f32
    %139 = vector.broadcast %138 : f32 to vector<2x8x32xf32>
    %140 = arith.mulf %139, %128 : vector<2x8x32xf32>
    %141 = arith.addf %137, %140 : vector<2x8x32xf32>
    %142 = tpu.concatenate %26, %51, %76, %101 in 2 : vector<2x8x32xf32>, vector<2x8x32xf32>, vector<2x8x32xf32>, vector<2x8x32xf32> -> vector<2x8x128xf32>
    %143 = vector.shape_cast %142 : vector<2x8x128xf32> to vector<16x128xf32>
    %c0_35 = arith.constant 0 : index
    %c0_36 = arith.constant 0 : index
    %144 = vector.load %arg3[%c0_35, %c0_36] : memref<128x32xf32, #tpu.memory_space<vmem>>, vector<128x32xf32>
    %cst_37 = arith.constant dense<0.000000e+00> : vector<16x32xf32>
    %145 = tpu.matmul %143, %144, %cst_37 {dimension_numbers = #tpu.dot_dimension_numbers<[1], [0], [0], [1], [0, 0, 1, 1], [], []>} : vector<16x128xf32>, vector<128x32xf32>, vector<16x32xf32> -> vector<16x32xf32>
    %c0_38 = arith.constant 0 : index
    %c0_39 = arith.constant 0 : index
    %146 = vector.load %arg4[%c0_38, %c0_39] : memref<1x32xf32, #tpu.memory_space<vmem>>, vector<1x32xf32>
    %147 = vector.broadcast %146 : vector<1x32xf32> to vector<16x32xf32>
    %148 = arith.addf %145, %147 : vector<16x32xf32>
    %149 = vector.shape_cast %148 : vector<16x32xf32> to vector<2x8x32xf32>
    %150 = arith.addf %149, %141 : vector<2x8x32xf32>
    %c0_40 = arith.constant 0 : index
    %c0_41 = arith.constant 0 : index
    %c0_42 = arith.constant 0 : index
    %151 = vector.load %arg5[%c0_40, %c0_41, %c0_42] : memref<2x8x32xf32, #tpu.memory_space<vmem>>, vector<2x8x32xf32>
    tpu.vector_store %arg5[%c0_40, %c0_41, %c0_42], %150 {strides = array<i32>} : memref<2x8x32xf32, #tpu.memory_space<vmem>>, vector<2x8x32xf32>,
    return
  }
}

</mosaic_0001>

<bundles_post_ra>
// kernel: tpu_custom_call.1
= control target key start
LH: loop header
LB: loop body
LE: loop exit
PB: predicated region body
PF: predicated region fallthrough
CT: control target
= control target key end

     0   :  { %v2120_v7 = vmov 0.0   ;;  %s2479_s0 = inlined_call_operand.vmem [shape: f32[2,8,32], index: 0, kind: input, shape index: {}]   ;;  %s2480_s1 = inlined_call_operand.vmem [shape: f32[32,384], index: 1, kind: input, shape index: {}]   ;;  %s2481_s2 = inlined_call_operand.vmem [shape: f32[1,384], index: 2, kind: input, shape index: {}]   ;;  %s2482_s3 = inlined_call_operand.vmem [shape: f32[128,32], index: 3, kind: input, shape index: {}]   ;;  %s2483_s4 = inlined_call_operand.vmem [shape: f32[1,32], index: 4, kind: input, shape index: {}]   ;;  %s2484_s5 = inlined_call_operand.hbm [shape: f32[2,8,32], index: 5, kind: output, shape index: {}]  }
   0x1   :  { %v24_v0 = vld [vmem:[%s2480_s1 + $0x8] sm:$0xff]  ;;  %v27_v1 = vld [vmem:[%s2480_s1 + $0x20] sm:$0xff]  ;;  %v26_v4 = vld [vmem:[%s2480_s1 + $0x18] sm:$0xff]  ;;  %123 = vmatprep.mubr.f32.mxu0 %v2120_v7  ;;  %1890 = vmatprep.subr.mxu1 %v2120_v7 }
   0x2   :  { %v23_v2 = vld [vmem:[%s2480_s1] sm:$0xff]  ;;  %v1985_v3 = vpack.c.bf16 %v27_v1, %v24_v0  ;;  %v30_v5 = vld [vmem:[%s2480_s1 + $0x38] sm:$0xff]  ;;  %v33_v6 = vld [vmem:[%s2480_s1 + $0x50] sm:$0xff] }
   0x3   :  { %v1987_v8 = vpack.c.bf16 %v26_v4, %v23_v2  ;;  %v1989_v9 = vpack.c.bf16 %v33_v6, %v30_v5  ;;  %v29_v10 = vld [vmem:[%s2480_s1 + $0x30] sm:$0xff]  ;;  %v32_v11 = vld [vmem:[%s2480_s1 + $0x48] sm:$0xff] }
   0x4   :  { %1986 = vmatprep.subr.bf16.mxu0 %v1985_v3  ;;  %v25_v12 = vld [vmem:[%s2480_s1 + $0x10] sm:$0xff]  ;;  %v28_v13 = vld [vmem:[%s2480_s1 + $0x28] sm:$0xff]  ;;  %v1991_v14 = vpack.c.bf16 %v32_v11, %v29_v10 }
   0x5   :  { %1988 = vmatpush1.bf16.msra.mxu0 %v1987_v8  ;;  %v1993_v15 = vpack.c.bf16 %v28_v13, %v25_v12 }
   0x6   :  { %1990 = vmatprep.subr.bf16.mxu0 %v1989_v9 }
   0x7   :  { %10 = vsyncpa [#allocation3], 0  ;;  %v31_v16 = vld [vmem:[%s2480_s1 + $0x40] sm:$0xff]  ;;  %v34_v17 = vld [vmem:[%s2480_s1 + $0x58] sm:$0xff]  ;;  %vm52_vm0 = vcmask 261120   ;;  %vm2121_vm1 = vmmov 0   ;;  %v37_v21 = vlaneseq }
   0x8   :  { %v21_v18 = vld [vmem:[%s2479_s0] sm:$0xff]  ;;  %v1997_v19 = vpack.c.bf16 %v34_v17, %v31_v16  ;;  %v22_v20 = vld [vmem:[%s2479_s0 + $0x8] sm:$0xff]  ;;  %1892 = vmatprep.mubr.msk.f32.mxu1 %vm2121_vm1, %v2120_v7  ;;  %vm365_vm2 = vcmask 64512   ;;  %s2123_s21 = smov 64   ;;  %s2124_s22 = smov 32   ;;  %vm1650_vm3 = vcmask 523264  }
   0x9   :  { %1992 = vmatpush1.bf16.msra.mxu0 %v1991_v14  ;;  %v38_v22 = vshrl.u32 %v37_v21, 7  ;;  %v35_v24 = vld [vmem:[%s2481_s2] sm:$0x7]  ;;  %s2122_s2 = smov 96   ;;  %vm1653_vm4 = vcmask 785408   ;;  %s2125_s1 = smov [#allocation2]  }
   0xa   :  { %1994 = vmatprep.subr.bf16.mxu0 %v1993_v15 }
   0xb   :  { %v39_v23 = vsub.s32 0, %v38_v22  ;;  %v43_v25 = vsub.s32 1, %v38_v22  ;;  %v47_v31 = vsub.s32 2, %v38_v22 }
   0xc   :  { %1774 = vmatmul.mubr.msk.f32.vlgmr.msra.gmra.mrb[0].mxu0 %vm52_vm0, %v21_v18 }
   0xd   :  { %129 = vmatprep.mubr.f32.mxu0 %v2120_v7  ;;  %1996 = vmatpush3.bf16.msra.mxu0 %v1993_v15  ;;  %v40_v26 = vrot.slane %v35_v24, %v39_v23  ;;  %v44_v27 = vrot.slane %v35_v24, %v43_v25  ;;  %v48_v37 = vrot.slane %v35_v24, %v47_v31 }
   0xe   :  { %1998 = vmatprep.subr.bf16.mxu0 %v1997_v19 }
  0x10   :  { %1775 = vmatmul.mubr.msk.f32.gmra.mrb[2].mxu0 %vm52_vm0, %v22_v20 }
  0x11   :  { %2000 = vmatpush3.bf16.msra.mxu0 %v1997_v19  ;;  %1867 = vmatprep.mubr.msk.f32.mxu0 %vm52_vm0, %v21_v18 }
  0x12   :  { %1870 = vmatprep.subr.mxu0 %v2120_v7 }
  0x14   :  { %1868 = vmatmul.mubr.msk.f32.vlgmr.msra.gmra.mrb[4].mxu0 %vm52_vm0, %v22_v20 }
  0x15   :  { %1872 = vmatprep.mubr.msk.f32.mxu0 %vm2121_vm1, %v2120_v7 }
  0xdf   :  { %v125_v28 = vpop.f32.mrb[0].mxu0 }
  0xe0   :  { %v126_v29 = vadd.f32 %v125_v28, %v40_v26  ;;  %v127_v30 = vpop.f32.mrb[1].mxu0 }
  0xe1   :  { %v2215_v32 = vadd.f32 %v127_v30, %v44_v27 }
  0xe2   :  { %v2219_v34 = vmul.f32 0.17677669, %v126_v29 }
  0xe3   :  { %v131_v33 = vpop.f32.mrb[2].mxu0  ;;  %1871 = vmatpush3.xpose.msk.msra.mxu0 %vm52_vm0, %v2215_v32 }
  0xe4   :  { %v132_v35 = vadd.f32 %v131_v33, %v40_v26  ;;  %v133_v36 = vpop.f32.mrb[3].mxu0  ;;  %1875 = vmatprep.subr.mxu0 %v2120_v7 }
  0xe5   :  { %v2222_v38 = vadd.f32 %v133_v36, %v44_v27 }
  0xe6   :  { %v2224_v39 = vmul.f32 0.17677669, %v132_v35  ;;  %1873 = vmatmul.mubr.msk.f32.vlgmr.msra.gmra.mrb[6].mxu0 %vm52_vm0, %v2219_v34 }
  0xe7   :  { %628 = vrot.lane.b32.xlu1 %v2222_v38, %s2122_s2  ;;  %1876 = vmatpush3.xpose.msk.msra.mxu0 %vm52_vm0, %v2222_v38  ;;  %v1869_v40 = vpop.f32.mrb[4].mxu0 }
  0xe8   :  { %1877 = vmatprep.mubr.msk.f32.mxu0 %vm2121_vm1, %v2120_v7  ;;  %v2234_v41 = vadd.f32 %v1869_v40, %v48_v37  ;;  %v202_v42 = vpop.f32.mrb[5].mxu0  ;;  %1880 = vmatprep.subr.mxu0 %v2120_v7 }
  0xe9   :  { %v2237_v43 = vadd.f32 %v202_v42, %v48_v37 }
  0xea   :  { %1878 = vmatmul.mubr.msk.f32.vlgmr.msra.gmra.mrb[8].mxu0 %vm52_vm0, %v2224_v39 }
  0xeb   :  { %548 = vrot.lane.b32.xlu1 %v2219_v34, %s2122_s2  ;;  %1881 = vmatpush3.msra.mxu0 %v2237_v43 }
  0xec   :  { %1882 = vmatprep.mubr.msk.f32.mxu0 %vm2121_vm1, %v2120_v7  ;;  %1885 = vmatprep.subr.mxu0 %v2120_v7 }
 0x159   :  { %v629_v54 = vpop.permute.xlu1 %628 }
 0x15d   :  { %v549_v58 = vpop.permute.xlu1 %548 }
 0x1b9   :  { %v285_v44 = vpop.f32.mrb[6].mxu0 }
 0x1ba   :  { %v1874_v45 = vpop.f32.mrb[7].mxu0  ;;  %v366_v46 = vsel %vm365_vm2, %v285_v44, -inf }
 0x1bb   :  { %367 = vmax.xlane.f32.xlu0 %v366_v46 }
 0x1bd   :  { %v361_v47 = vpop.f32.mrb[8].mxu0 }
 0x1be   :  { %v1879_v48 = vpop.f32.mrb[9].mxu0  ;;  %v369_v49 = vsel %vm365_vm2, %v361_v47, -inf }
 0x1bf   :  { %370 = vmax.xlane.f32.xlu0 %v369_v49 }
 0x1d5   :  { %550 = vrot.lane.b32.xlu0 %v2215_v32, %s2122_s2 }
 0x248   :  { %v368_v50 = vpop.xlane.xlu0 %367 }
 0x249   :  { %v372_v51 = vsub.f32 %v285_v44, %v368_v50 }
 0x24b   :  { %v374_v52 = vmul.f32 1.442695, %v372_v51 }
 0x24c   :  { %v371_v53 = vpop.xlane.xlu0 %370 }
 0x24d   :  { %2064 = vpow2.f32 %v374_v52  ;;  %v373_v55 = vsub.f32 %v361_v47, %v371_v53 }
 0x24f   :  { %v376_v56 = vmul.f32 1.442695, %v373_v55 }
 0x250   :  { %v551_v57 = vpop.permute.xlu0 %550 }
 0x251   :  { %2066 = vpow2.f32 %v376_v56  ;;  %1891 = vmatpush3.xpose.msk.msra.mxu1 %vm52_vm0, %v551_v57 }
 0x252   :  { %1900 = vmatprep.subr.mxu1 %v2120_v7 }
 0x254   :  { %1893 = vmatmul.mubr.msk.f32.vlgmr.msra.gmra.mrb[0].mxu1 %vm52_vm0, %v549_v58 }
 0x255   :  { %1902 = vmatprep.mubr.msk.f32.mxu1 %vm2121_vm1, %v2120_v7 }
 0x257   :  { %v2065_v59 = vpop.eup %2064 }
 0x258   :  { %v378_v60 = vsel %vm365_vm2, %v2065_v59, 0.0 }
 0x259   :  { %379 = vadd.xlane.f32.xlu1 %v378_v60 }
 0x25b   :  { %v2067_v61 = vpop.eup %2066 }
 0x25c   :  { %v381_v62 = vsel %vm365_vm2, %v2067_v61, 0.0 }
 0x25d   :  { %382 = vadd.xlane.f32.xlu1 %v381_v62 }
 0x26e   :  { %626 = vrot.lane.b32.xlu1 %v2224_v39, %s2122_s2 }
 0x2e6   :  { %v380_v63 = vpop.xlane.xlu1 %379 }
 0x2e7   :  { %2068 = vrcp.f32 %v380_v63 }
 0x2ea   :  { %v383_v0 = vpop.xlane.xlu1 %382 }
 0x2eb   :  { %2070 = vrcp.f32 %v383_v0 }
 0x2ee   :  { %v627_v11 = vpop.permute.xlu1 %626 }
 0x2f1   :  { %v2069_v1 = vpop.eup %2068 }
 0x2f2   :  { %v386_v2 = vmul.f32 %v2069_v1, %v2065_v59 }
 0x2f4   :  { %1883 = vmatmul.mubr.msk.f32.vlgmr.msra.gmra.mrb[10].mxu0 %vm365_vm2, %v386_v2  ;;  %v534_v5 = vand.u32 2147483647, %v386_v2 }
 0x2f5   :  { %v2071_v3 = vpop.eup %2070  ;;  %1886 = vmatpush3.msra.mxu0 %v2234_v41  ;;  %1887 = vmatprep.mubr.msk.f32.mxu0 %vm2121_vm1, %v2120_v7 }
 0x2f6   :  { %v387_v4 = vmul.f32 %v2071_v3, %v2067_v61  ;;  %1895 = vmatprep.subr.mxu0 %v2120_v7  ;;  %v536_v8 = vsel %vm365_vm2, %v534_v5, 0.0 }
 0x2f8   :  { %1888 = vmatmul.mubr.msk.f32.vlgmr.msra.gmra.mrb[12].mxu0 %vm365_vm2, %v387_v4  ;;  %v535_v6 = vand.u32 2147483647, %v387_v4 }
 0x2f9   :  { %1897 = vmatprep.mubr.msk.f32.mxu0 %vm2121_vm1, %v2120_v7 }
 0x2fa   :  { %v537_v9 = vsel %vm365_vm2, %v535_v6, 0.0 }
 0x2fb   :  { %v2270_v10 = vadd.f32 %v537_v9, %v536_v8 }
 0x2fc   :  { %1896 = vmatpush3.xpose.msk.msra.mxu0 %vm52_vm0, %v629_v54 }
 0x2fd   :  { %1905 = vmatprep.subr.mxu0 %v2120_v7 }
 0x2ff   :  { %1898 = vmatmul.mubr.msk.f32.vlgmr.msra.gmra.mrb[14].mxu0 %vm52_vm0, %v627_v11 }
 0x300   :  { %1907 = vmatprep.mubr.msk.f32.mxu0 %vm2121_vm1, %v2120_v7 }
 0x327   :  { %v622_v12 = vpop.f32.mrb[0].mxu1 }
 0x328   :  { %v1894_v13 = vpop.f32.mrb[1].mxu1  ;;  %v704_v14 = vsel %vm365_vm2, %v622_v12, -inf }
 0x329   :  { %705 = vmax.xlane.f32.xlu0 %v704_v14 }
 0x3b6   :  { %v706_v15 = vpop.xlane.xlu0 %705 }
 0x3b7   :  { %v710_v16 = vsub.f32 %v622_v12, %v706_v15 }
 0x3b9   :  { %v712_v17 = vmul.f32 1.442695, %v710_v16 }
 0x3bb   :  { %2072 = vpow2.f32 %v712_v17 }
 0x3c5   :  { %v2073_v18 = vpop.eup %2072 }
 0x3c6   :  { %v716_v19 = vsel %vm365_vm2, %v2073_v18, 0.0 }
 0x3c7   :  { %717 = vadd.xlane.f32.xlu0 %v716_v19  ;;  %v2279_v20 = vpop.f32.mrb[10].mxu0 }
 0x3c8   :  { %v1884_v21 = vpop.f32.mrb[11].mxu0 }
 0x3cb   :  { %v2281_v22 = vpop.f32.mrb[12].mxu0 }
 0x3cc   :  { %v1889_v23 = vpop.f32.mrb[13].mxu0 }
 0x3d2   :  { %v700_v24 = vpop.f32.mrb[14].mxu0 }
 0x3d3   :  { %v1899_v25 = vpop.f32.mrb[15].mxu0  ;;  %v707_v26 = vsel %vm365_vm2, %v700_v24, -inf }
 0x3d4   :  { %708 = vmax.xlane.f32.xlu1 %v707_v26 }
 0x3dd   :  { %727 = vrot.lane.b32.xlu0 %v2237_v43, %s2122_s2 }
 0x3e5   :  { %804 = vrot.lane.b32.xlu1 %v2234_v41, %s2122_s2 }
 0x3e9   :  { %896 = vrot.lane.b32.xlu1 %v2215_v32, %s2123_s21 }
 0x3ed   :  { %974 = vrot.lane.b32.xlu1 %v2222_v38, %s2123_s21 }
 0x3f1   :  { %972 = vrot.lane.b32.xlu1 %v2224_v39, %s2123_s21 }
 0x454   :  { %v718_v27 = vpop.xlane.xlu0 %717 }
 0x455   :  { %2074 = vrcp.f32 %v718_v27 }
 0x458   :  { %v728_v28 = vpop.permute.xlu0 %727 }
 0x459   :  { %1901 = vmatpush3.msra.mxu1 %v728_v28 }
 0x45a   :  { %1910 = vmatprep.subr.mxu1 %v2120_v7 }
 0x45f   :  { %v2075_v29 = vpop.eup %2074 }
 0x460   :  { %v724_v30 = vmul.f32 %v2075_v29, %v2073_v18 }
 0x461   :  { %v709_v31 = vpop.xlane.xlu1 %708 }
 0x462   :  { %v711_v33 = vsub.f32 %v700_v24, %v709_v31  ;;  %1903 = vmatmul.mubr.msk.f32.vlgmr.msra.gmra.mrb[2].mxu1 %vm365_vm2, %v724_v30  ;;  %v880_v49 = vand.u32 2147483647, %v724_v30 }
 0x463   :  { %1912 = vmatprep.mubr.msk.f32.mxu1 %vm2121_vm1, %v2120_v7 }
 0x464   :  { %v714_v35 = vmul.f32 1.442695, %v711_v33  ;;  %v882_v51 = vsel %vm365_vm2, %v880_v49, 0.0 }
 0x465   :  { %v805_v36 = vpop.permute.xlu1 %804 }
 0x466   :  { %2076 = vpow2.f32 %v714_v35  ;;  %1906 = vmatpush3.msra.mxu0 %v805_v36 }
 0x467   :  { %1915 = vmatprep.subr.mxu0 %v2120_v7 }
 0x469   :  { %v897_v37 = vpop.permute.xlu1 %896 }
 0x46a   :  { %1911 = vmatpush3.xpose.msk.msra.mxu1 %vm52_vm0, %v897_v37 }
 0x46b   :  { %1920 = vmatprep.subr.mxu1 %v2120_v7 }
 0x46d   :  { %v975_v47 = vpop.permute.xlu1 %974 }
 0x470   :  { %v2077_v40 = vpop.eup %2076 }
 0x471   :  { %v719_v42 = vsel %vm365_vm2, %v2077_v40, 0.0  ;;  %v973_v53 = vpop.permute.xlu1 %972 }
 0x472   :  { %720 = vadd.xlane.f32.xlu0 %v719_v42 }
 0x488   :  { %894 = vrot.lane.b32.xlu0 %v2219_v34, %s2123_s21 }
 0x4ff   :  { %v721_v44 = vpop.xlane.xlu0 %720 }
 0x500   :  { %2078 = vrcp.f32 %v721_v44 }
 0x503   :  { %v895_v45 = vpop.permute.xlu0 %894 }
 0x504   :  { %1913 = vmatmul.mubr.msk.f32.vlgmr.msra.gmra.mrb[4].mxu1 %vm52_vm0, %v895_v45 }
 0x505   :  { %1922 = vmatprep.mubr.msk.f32.mxu1 %vm2121_vm1, %v2120_v7 }
 0x50a   :  { %v2079_v46 = vpop.eup %2078 }
 0x50b   :  { %v725_v48 = vmul.f32 %v2079_v46, %v2077_v40 }
 0x50d   :  { %1908 = vmatmul.mubr.msk.f32.vlgmr.msra.gmra.mrb[16].mxu0 %vm365_vm2, %v725_v48  ;;  %v881_v50 = vand.u32 2147483647, %v725_v48 }
 0x50e   :  { %1916 = vmatpush3.xpose.msk.msra.mxu0 %vm52_vm0, %v975_v47  ;;  %1917 = vmatprep.mubr.msk.f32.mxu0 %vm2121_vm1, %v2120_v7 }
 0x50f   :  { %1925 = vmatprep.subr.mxu0 %v2120_v7  ;;  %v883_v52 = vsel %vm365_vm2, %v881_v50, 0.0 }
 0x510   :  { %v2314_v54 = vadd.f32 %v883_v52, %v882_v51 }
 0x511   :  { %1918 = vmatmul.mubr.msk.f32.vlgmr.msra.gmra.mrb[18].mxu0 %vm52_vm0, %v973_v53 }
 0x512   :  { %1927 = vmatprep.mubr.msk.f32.mxu0 %vm2121_vm1, %v2120_v7 }
 0x535   :  { %v2319_v55 = vpop.f32.mrb[2].mxu1 }
 0x536   :  { %v1904_v56 = vpop.f32.mrb[3].mxu1 }
 0x5d7   :  { %v968_v57 = vpop.f32.mrb[4].mxu1 }
 0x5d8   :  { %v1914_v58 = vpop.f32.mrb[5].mxu1  ;;  %v1050_v59 = vsel %vm365_vm2, %v968_v57, -inf }
 0x5d9   :  { %1051 = vmax.xlane.f32.xlu0 %v1050_v59 }
 0x5e0   :  { %v2322_v60 = vpop.f32.mrb[16].mxu0 }
 0x5e1   :  { %v2049_v61 = vpack.i.bf16 %v2322_v60, %v2319_v55  ;;  %v1909_v62 = vpop.f32.mrb[17].mxu0 }
 0x5e4   :  { %v1046_v63 = vpop.f32.mrb[18].mxu0 }
 0x5e5   :  { %v1919_v0 = vpop.f32.mrb[19].mxu0  ;;  %v1053_v1 = vsel %vm365_vm2, %v1046_v63, -inf }
 0x5e6   :  { %1054 = vmax.xlane.f32.xlu1 %v1053_v1 }
 0x5f7   :  { %1148 = vrot.lane.b32.xlu1 %v2234_v41, %s2123_s21 }
 0x5fb   :  { %1240 = vrot.lane.b32.xlu1 %v2215_v32, %s2124_s22 }
 0x5ff   :  { %1318 = vrot.lane.b32.xlu1 %v2222_v38, %s2124_s22 }
 0x603   :  { %1316 = vrot.lane.b32.xlu1 %v2224_v39, %s2124_s22 }
 0x666   :  { %v1052_v2 = vpop.xlane.xlu0 %1051 }
 0x667   :  { %v1056_v3 = vsub.f32 %v968_v57, %v1052_v2 }
 0x669   :  { %v1058_v4 = vmul.f32 1.442695, %v1056_v3 }
 0x66b   :  { %2080 = vpow2.f32 %v1058_v4 }
 0x673   :  { %v1055_v5 = vpop.xlane.xlu1 %1054 }
 0x674   :  { %v1057_v32 = vsub.f32 %v1046_v63, %v1055_v5 }
 0x675   :  { %v2081_v6 = vpop.eup %2080 }
 0x676   :  { %v1062_v8 = vsel %vm365_vm2, %v2081_v6, 0.0  ;;  %v1060_v38 = vmul.f32 1.442695, %v1057_v32 }
 0x677   :  { %1063 = vadd.xlane.f32.xlu0 %v1062_v8  ;;  %v1149_v9 = vpop.permute.xlu1 %1148 }
 0x678   :  { %1926 = vmatpush3.msra.mxu0 %v1149_v9  ;;  %2082 = vpow2.f32 %v1060_v38 }
 0x679   :  { %1935 = vmatprep.subr.mxu0 %v2120_v7 }
 0x67b   :  { %v1241_v16 = vpop.permute.xlu1 %1240 }
 0x67f   :  { %v1319_v19 = vpop.permute.xlu1 %1318 }
 0x682   :  { %v2083_v39 = vpop.eup %2082 }
 0x683   :  { %v1065_v11 = vsel %vm365_vm2, %v2083_v39, 0.0  ;;  %v1317_v27 = vpop.permute.xlu1 %1316 }
 0x68d   :  { %1072 = vrot.lane.b32.xlu0 %v2237_v43, %s2123_s21 }
 0x6ac   :  { %1066 = vadd.xlane.f32.xlu0 %v1065_v11 }
 0x6c2   :  { %1238 = vrot.lane.b32.xlu0 %v2219_v34, %s2124_s22 }
 0x704   :  { %v1064_v12 = vpop.xlane.xlu0 %1063 }
 0x705   :  { %2084 = vrcp.f32 %v1064_v12 }
 0x708   :  { %v1073_v13 = vpop.permute.xlu0 %1072 }
 0x709   :  { %1921 = vmatpush3.msra.mxu1 %v1073_v13 }
 0x70a   :  { %1930 = vmatprep.subr.mxu1 %v2120_v7 }
 0x70f   :  { %v2085_v14 = vpop.eup %2084 }
 0x710   :  { %v1070_v15 = vmul.f32 %v2085_v14, %v2081_v6 }
 0x712   :  { %1923 = vmatmul.mubr.msk.f32.vlgmr.msra.gmra.mrb[6].mxu1 %vm365_vm2, %v1070_v15  ;;  %v1224_v23 = vand.u32 2147483647, %v1070_v15 }
 0x713   :  { %1931 = vmatpush3.xpose.msk.msra.mxu1 %vm52_vm0, %v1241_v16  ;;  %1932 = vmatprep.mubr.msk.f32.mxu1 %vm2121_vm1, %v2120_v7 }
 0x714   :  { %1940 = vmatprep.subr.mxu1 %v2120_v7  ;;  %v1226_v25 = vsel %vm365_vm2, %v1224_v23, 0.0  ;;  %v1658_v23 = vld [vmem:[%s2482_s3 + $0x10] sm:$0xff] }
 0x739   :  { %v1067_v17 = vpop.xlane.xlu0 %1066 }
 0x73a   :  { %2086 = vrcp.f32 %v1067_v17 }
 0x73d   :  { %v1239_v34 = vpop.permute.xlu0 %1238 }
 0x73e   :  { %1933 = vmatmul.mubr.msk.f32.vlgmr.msra.gmra.mrb[8].mxu1 %vm52_vm0, %v1239_v34 }
 0x73f   :  { %1942 = vmatprep.mubr.msk.f32.mxu1 %vm2121_vm1, %v2120_v7 }
 0x744   :  { %v2087_v18 = vpop.eup %2086 }
 0x745   :  { %v1071_v21 = vmul.f32 %v2087_v18, %v2083_v39 }
 0x747   :  { %1928 = vmatmul.mubr.msk.f32.vlgmr.msra.gmra.mrb[20].mxu0 %vm365_vm2, %v1071_v21  ;;  %v1225_v24 = vand.u32 2147483647, %v1071_v21  ;;  %v1657_v21 = vld [vmem:[%s2482_s3 + $0x8] sm:$0xff] }
 0x748   :  { %1936 = vmatpush3.xpose.msk.msra.mxu0 %vm52_vm0, %v1319_v19  ;;  %1937 = vmatprep.mubr.msk.f32.mxu0 %vm2121_vm1, %v2120_v7  ;;  %v1656_v19 = vld [vmem:[%s2482_s3] sm:$0xff] }
 0x749   :  { %1945 = vmatprep.subr.mxu0 %v2120_v7  ;;  %v1227_v26 = vsel %vm365_vm2, %v1225_v24, 0.0  ;;  %v2001_v24 = vpack.c.bf16 %v1657_v21, %v1656_v19 }
 0x74a   :  { %v2358_v28 = vadd.f32 %v1227_v26, %v1226_v25  ;;  %v1659_v25 = vld [vmem:[%s2482_s3 + $0x18] sm:$0xff] }
 0x74b   :  { %1938 = vmatmul.mubr.msk.f32.vlgmr.msra.gmra.mrb[22].mxu0 %vm52_vm0, %v1317_v27  ;;  %v2005_v26 = vpack.c.bf16 %v1659_v25, %v1658_v23  ;;  %v1660_v27 = vld [vmem:[%s2482_s3 + $0x20] sm:$0xff] }
 0x74c   :  { %1947 = vmatprep.mubr.msk.f32.mxu0 %vm2121_vm1, %v2120_v7 }
 0x7e5   :  { %v2363_v29 = vpop.f32.mrb[6].mxu1 }
 0x7e6   :  { %v1924_v30 = vpop.f32.mrb[7].mxu1 }
 0x7e7   :  { %v1661_v30 = vld [vmem:[%s2482_s3 + $0x28] sm:$0xff] }
 0x811   :  { %v1312_v31 = vpop.f32.mrb[8].mxu1 }
 0x812   :  { %v1934_v33 = vpop.f32.mrb[9].mxu1  ;;  %v1394_v35 = vsel %vm365_vm2, %v1312_v31, -inf }
 0x813   :  { %1395 = vmax.xlane.f32.xlu0 %v1394_v35  ;;  %v1662_v33 = vld [vmem:[%s2482_s3 + $0x30] sm:$0xff]  ;;  %v1663_v35 = vld [vmem:[%s2482_s3 + $0x38] sm:$0xff] }
 0x81a   :  { %v2366_v36 = vpop.f32.mrb[20].mxu0 }
 0x81b   :  { %v2054_v37 = vpack.i.bf16 %v2366_v36, %v2363_v29  ;;  %v1929_v40 = vpop.f32.mrb[21].mxu0 }
 0x81c   :  { %v1664_v40 = vld [vmem:[%s2482_s3 + $0x40] sm:$0xff] }
 0x81e   :  { %v1390_v42 = vpop.f32.mrb[22].mxu0 }
 0x81f   :  { %v1939_v44 = vpop.f32.mrb[23].mxu0  ;;  %v1397_v45 = vsel %vm365_vm2, %v1390_v42, -inf }
 0x820   :  { %1398 = vmax.xlane.f32.xlu1 %v1397_v45  ;;  %v1666_v45 = vld [vmem:[%s2482_s3 + $0x50] sm:$0xff] }
 0x831   :  { %1492 = vrot.lane.b32.xlu1 %v2234_v41, %s2124_s22 }
 0x835   :  { %2050 = vrot.lane.b32.xlu1 %v2049_v61, %s2124_s22 }
 0x839   :  { %2055 = vrot.lane.b32.xlu1 %v2054_v37, %s2123_s21  ;;  %v2013_v37 = vpack.c.bf16 %v1663_v35, %v1662_v33  ;;  %s1763_s21 = sshll.u32 %s2125_s1, 4  ;;  %s1764_s21 = int_to_ptr.vmem [resolvable:$true] %s1763_s21 }
 0x83a   :  { %p2101_p4 = scmp.lt.s32.totalorder %s1764_s21, %s1764_s21 }
 0x85d   :  { %539 = vadd.xlane.f32.xlu1 %v2270_v10 }
 0x8a0   :  { %v1396_v7 = vpop.xlane.xlu0 %1395 }
 0x8a1   :  { %v1400_v46 = vsub.f32 %v1312_v31, %v1396_v7  ;;  %v2009_v31 = vpack.c.bf16 %v1661_v30, %v1660_v27  ;;  %v1667_v7 = vld [vmem:[%s2482_s3 + $0x58] sm:$0xff] }
 0x8a3   :  { %v1402_v47 = vmul.f32 1.442695, %v1400_v46  ;;  %v2021_v46 = vpack.c.bf16 %v1667_v7, %v1666_v45  ;;  %v1802_v45 = vld [vmem:[%s2483_s4] ss:$0 sm:$0xff] }
 0x8a5   :  { %2088 = vpow2.f32 %v1402_v47  ;;  %v1668_v47 = vld [vmem:[%s2482_s3 + $0x60] sm:$0xff] }
 0x8ad   :  { %v1399_v48 = vpop.xlane.xlu1 %1398 }
 0x8ae   :  { %v1401_v49 = vsub.f32 %v1390_v42, %v1399_v48  ;;  %v1665_v42 = vld [vmem:[%s2482_s3 + $0x48] sm:$0xff] }
 0x8af   :  { %v2089_v50 = vpop.eup %2088  ;;  %v2017_v44 = vpack.c.bf16 %v1665_v42, %v1664_v40  ;;  %v1669_v48 = vld [vmem:[%s2482_s3 + $0x68] sm:$0xff] }
 0x8b0   :  { %v1404_v51 = vmul.f32 1.442695, %v1401_v49  ;;  %v1406_v52 = vsel %vm365_vm2, %v2089_v50, 0.0  ;;  %v2025_v49 = vpack.c.bf16 %v1669_v48, %v1668_v47 }
 0x8b1   :  { %1407 = vadd.xlane.f32.xlu0 %v1406_v52  ;;  %v1493_v41 = vpop.permute.xlu1 %1492 }
 0x8b2   :  { %2090 = vpow2.f32 %v1404_v51  ;;  %1946 = vmatpush3.msra.mxu0 %v1493_v41  ;;  %v1671_v51 = vld [vmem:[%s2482_s3 + $0x78] sm:$0xff] }
 0x8b5   :  { %v2051_v53 = vpop.permute.xlu1 %2050 }
 0x8b6   :  { %v2053_v56 = vunpack.i.h.bf16 %v2051_v53  ;;  %v2052_v57 = vunpack.i.l.bf16 %v2051_v53 }
 0x8b8   :  { %v1649_v10 = vsel %vm52_vm0, %v2281_v22, %v2053_v56  ;;  %v1648_v58 = vsel %vm52_vm0, %v2279_v20, %v2052_v57 }
 0x8b9   :  { %v2056_v59 = vpop.permute.xlu1 %2055 }
 0x8ba   :  { %v2058_v61 = vunpack.i.h.bf16 %v2056_v59  ;;  %v2057_v62 = vunpack.i.l.bf16 %v2056_v59 }
 0x8bc   :  { %v2091_v63 = vpop.eup %2090  ;;  %v2384_v0 = vsel %vm1650_vm3, %v1648_v58, %v2057_v62  ;;  %v2386_v1 = vsel %vm1650_vm3, %v1649_v10, %v2058_v61 }
 0x8bd   :  { %v1409_v2 = vsel %vm365_vm2, %v2091_v63, 0.0 }
 0x8be   :  { %1410 = vadd.xlane.f32.xlu0 %v1409_v2 }
 0x8d4   :  { %1416 = vrot.lane.b32.xlu0 %v2237_v43, %s2124_s22  ;;  %s2096_s22 = scalar_lea.vmem %s1764_s21, 256 }
 0x8d5   :  { %p2097_p3 = scmp.ne.s32.totalorder %s1764_s21, %s2096_s22  ;;  %p2102_p5 = scmp.lt.s32.totalorder %s2096_s22, %s2096_s22 }
 0x8d7   :  { %p2103_p6 = por %p2102_p5, %p2101_p4 }
 0x8d9   :  { %p2104_p7 = pnand %p2103_p6, %p2097_p3 }
 0x8ea   :  { %v540_v3 = vpop.xlane.xlu1 %539 }
 0x8eb   :  { %v541_v4 = vrot.slane %v540_v3, 4 }
 0x8ed   :  { %v542_v5 = vadd.f32 %v541_v4, %v540_v3 }
 0x8ef   :  { %v543_v6 = vrot.slane %v542_v5, 2 }
 0x8f1   :  { %v544_v8 = vadd.f32 %v543_v6, %v542_v5 }
 0x8f3   :  { %v545_v9 = vrot.slane %v544_v8, 1 }
 0x8f5   :  { %v546_v32 = vadd.f32 %v545_v9, %v544_v8 }
 0x8f7   :  { %2033 = vpush %v546_v32 }
 0x93e   :  { %v1408_v38 = vpop.xlane.xlu0 %1407 }
 0x93f   :  { %2092 = vrcp.f32 %v1408_v38 }
 0x949   :  { %v2093_v11 = vpop.eup %2092 }
 0x94a   :  { %v1414_v12 = vmul.f32 %v2093_v11, %v2089_v50  ;;  %v1670_v50 = vld [vmem:[%s2482_s3 + $0x70] sm:$0xff]  ;;  %s2034_s3 = spop %2033 }
 0x94b   :  { %v1411_v39 = vpop.xlane.xlu0 %1410  ;;  %v2029_v52 = vpack.c.bf16 %v1671_v51, %v1670_v50 }
 0x94c   :  { %2094 = vrcp.f32 %v1411_v39  ;;  %v1568_v15 = vand.u32 2147483647, %v1414_v12 }
 0x94e   :  { %v1570_v17 = vsel %vm365_vm2, %v1568_v15, 0.0 }
 0x94f   :  { %v1417_v13 = vpop.permute.xlu0 %1416 }
 0x950   :  { %1941 = vmatpush3.msra.mxu1 %v1417_v13 }
 0x951   :  { %1943 = vmatmul.mubr.msk.f32.vlgmr.msra.gmra.mrb[10].mxu1 %vm365_vm2, %v1414_v12  ;;  %2002 = vmatprep.subr.bf16.mxu1 %v2001_v24 }
 0x952   :  { %2004 = vmatpush3.bf16.msra.mxu1 %v2001_v24 }
 0x953   :  { %2006 = vmatprep.subr.bf16.mxu1 %v2005_v26 }
 0x956   :  { %v2095_v14 = vpop.eup %2094  ;;  %2008 = vmatpush3.bf16.msra.mxu1 %v2005_v26 }
 0x957   :  { %v1415_v43 = vmul.f32 %v2095_v14, %v2091_v63  ;;  %2010 = vmatprep.subr.bf16.mxu1 %v2009_v31 }
 0x959   :  { %1948 = vmatmul.mubr.msk.f32.vlgmr.msra.gmra.mrb[24].mxu0 %vm365_vm2, %v1415_v43  ;;  %v1569_v16 = vand.u32 2147483647, %v1415_v43 }
 0x95a   :  { %2012 = vmatpush3.bf16.msra.mxu1 %v2009_v31 }
 0x95b   :  { %v1571_v34 = vsel %vm365_vm2, %v1569_v16, 0.0  ;;  %2014 = vmatprep.subr.bf16.mxu1 %v2013_v37 }
 0x95c   :  { %v1572_v18 = vadd.f32 %v1571_v34, %v1570_v17 }
 0x95e   :  { %2016 = vmatpush3.bf16.msra.mxu1 %v2013_v37 }
 0x95f   :  { %2018 = vmatprep.subr.bf16.mxu1 %v2017_v44 }
 0x962   :  { %2020 = vmatpush3.bf16.msra.mxu1 %v2017_v44 }
 0x963   :  { %2022 = vmatprep.subr.bf16.mxu1 %v2021_v46 }
 0x966   :  { %2024 = vmatpush3.bf16.msra.mxu1 %v2021_v46 }
 0x967   :  { %2026 = vmatprep.subr.bf16.mxu1 %v2025_v49 }
 0x96a   :  { %2028 = vmatpush3.bf16.msra.mxu1 %v2025_v49 }
 0x96b   :  { %2030 = vmatprep.subr.bf16.mxu1 %v2029_v52 }
 0x96e   :  { %2032 = vmatpush3.bf16.msra.mxu1 %v2029_v52 }
 0xa24   :  { %v2443_v41 = vpop.f32.mrb[10].mxu1 }
 0xa25   :  { %v1944_v53 = vpop.f32.mrb[11].mxu1 }
 0xa2c   :  { %v2445_v56 = vpop.f32.mrb[24].mxu0 }
 0xa2d   :  { %v2059_v57 = vpack.i.bf16 %v2445_v56, %v2443_v41  ;;  %v1949_v10 = vpop.f32.mrb[25].mxu0 }
 0xa2f   :  { %2060 = vrot.lane.b32.xlu0 %v2059_v57, %s2122_s2 }
 0xa4e   :  { %885 = vadd.xlane.f32.xlu0 %v2314_v54 }
 0xa52   :  { %1229 = vadd.xlane.f32.xlu0 %v2358_v28 }
 0xa56   :  { %1573 = vadd.xlane.f32.xlu0 %v1572_v18 }
 0xaa1   :  { %v2061_v58 = vpop.permute.xlu0 %2060 }
 0xaa2   :  { %v2063_v59 = vunpack.i.h.bf16 %v2061_v58  ;;  %v2062_v61 = vunpack.i.l.bf16 %v2061_v58 }
 0xaa4   :  { %v1654_v62 = vsel %vm1653_vm4, %v2384_v0, %v2062_v61  ;;  %v1655_v63 = vsel %vm1653_vm4, %v2386_v1, %v2063_v59 }
 0xaa5   :  { %1982 = vmatprep.mubr.f32.mxu1 %v1654_v62 }
 0xaa6   :  { %1983 = vmatmul.mubr.f32.vlgmr.msra.gmra.mrb[12].mxu1 %v1655_v63 }
 0xadb   :  { %v886_v2 = vpop.xlane.xlu0 %885 }
 0xadc   :  { %v887_v3 = vrot.slane %v886_v2, 4 }
 0xade   :  { %v888_v4 = vadd.f32 %v887_v3, %v886_v2 }
 0xadf   :  { %v1230_v5 = vpop.xlane.xlu0 %1229 }
 0xae0   :  { %v889_v6 = vrot.slane %v888_v4, 2  ;;  %v1231_v8 = vrot.slane %v1230_v5, 4 }
 0xae2   :  { %v1232_v54 = vadd.f32 %v1231_v8, %v1230_v5  ;;  %v890_v9 = vadd.f32 %v889_v6, %v888_v4 }
 0xae3   :  { %v1574_v28 = vpop.xlane.xlu0 %1573 }
 0xae4   :  { %v1233_v32 = vrot.slane %v1232_v54, 2  ;;  %v1575_v38 = vrot.slane %v1574_v28, 4  ;;  %v891_v39 = vrot.slane %v890_v9, 1 }
 0xae6   :  { %v1576_v11 = vadd.f32 %v1575_v38, %v1574_v28  ;;  %v892_v12 = vadd.f32 %v891_v39, %v890_v9  ;;  %v1234_v13 = vadd.f32 %v1233_v32, %v1232_v54 }
 0xae8   :  { %v1577_v0 = vrot.slane %v1576_v11, 2  ;;  %2035 = vpush %v892_v12  ;;  %v1235_v1 = vrot.slane %v1234_v13, 1 }
 0xaea   :  { %v1578_v14 = vadd.f32 %v1577_v0, %v1576_v11  ;;  %v1236_v43 = vadd.f32 %v1235_v1, %v1234_v13 }
 0xaec   :  { %2037 = vpush %v1236_v43  ;;  %v1579_v15 = vrot.slane %v1578_v14, 1 }
 0xaee   :  { %v1580_v16 = vadd.f32 %v1579_v15, %v1578_v14 }
 0xaf0   :  { %2039 = vpush %v1580_v16 }
 0xb19   :  { %s2036_s2 = spop %2035 }
 0xb1a   :  { %p1582_p0 = scmp.gt.f32.partialorder %s2036_s2, %s2034_s3 }
 0xb1c   :  { %s1583_s28 = scalar_select %p1582_p0, 1, 0 }
 0xb1d   :  { %s2038_s9 = spop %2037 }
 0xb1e   :  { %s1584_s29 = scvt.s32.f32 %s1583_s28 }
 0xb20   :  { %v1585_v17 = vstv %s1584_s29  ;;  %s1588_s30 = ssub.f32 1.0, %s1584_s29  ;;  %s1594_s6 = smul.f32 %s2036_s2, %s1584_s29 }
 0xb21   :  { %v1586_v18 = vmul.f32 %v1585_v17, %v2319_v55  ;;  %v1587_v19 = vmul.f32 %v1585_v17, %v2322_v60  ;;  %s2040_s16 = spop %2039 }
 0xb22   :  { %v1589_v34 = vstv %s1588_s30  ;;  %s1595_s7 = smul.f32 %s2034_s3, %s1588_s30 }
 0xb23   :  { %v1590_v21 = vmul.f32 %v1589_v34, %v2279_v20  ;;  %v1591_v23 = vmul.f32 %v1589_v34, %v2281_v22 }
 0xb24   :  { %s1596_s8 = sadd.f32 %s1595_s7, %s1594_s6 }
 0xb25   :  { %v1592_v24 = vadd.f32 %v1590_v21, %v1586_v18  ;;  %v1593_v25 = vadd.f32 %v1591_v23, %v1587_v19 }
 0xb26   :  { %p1597_p1 = scmp.gt.f32.partialorder %s2038_s9, %s1596_s8 }
 0xb28   :  { %s1598_s10 = scalar_select %p1597_p1, 1, 0 }
 0xb2a   :  { %s1599_s11 = scvt.s32.f32 %s1598_s10 }
 0xb2c   :  { %v1600_v26 = vstv %s1599_s11  ;;  %s1603_s12 = ssub.f32 1.0, %s1599_s11  ;;  %s1609_s13 = smul.f32 %s2038_s9, %s1599_s11 }
 0xb2d   :  { %v1601_v55 = vmul.f32 %v1600_v26, %v2363_v29  ;;  %v1602_v60 = vmul.f32 %v1600_v26, %v2366_v36 }
 0xb2e   :  { %v1604_v27 = vstv %s1603_s12  ;;  %s1610_s14 = smul.f32 %s1603_s12, %s1596_s8 }
 0xb2f   :  { %v1605_v30 = vmul.f32 %v1604_v27, %v1592_v24  ;;  %v1606_v20 = vmul.f32 %v1604_v27, %v1593_v25 }
 0xb30   :  { %s1611_s15 = sadd.f32 %s1610_s14, %s1609_s13 }
 0xb31   :  { %v1607_v22 = vadd.f32 %v1605_v30, %v1601_v55  ;;  %v1608_v31 = vadd.f32 %v1606_v20, %v1602_v60 }
 0xb32   :  { %p1612_p2 = scmp.gt.f32.partialorder %s2040_s16, %s1611_s15 }
 0xb34   :  { %s1613_s17 = scalar_select %p1612_p2, 1, 0 }
 0xb36   :  { %s1614_s18 = scvt.s32.f32 %s1613_s17 }
 0xb38   :  { %v1615_v33 = vstv %s1614_s18  ;;  %s1618_s19 = ssub.f32 1.0, %s1614_s18 }
 0xb39   :  { %v1616_v37 = vmul.f32 %v1615_v33, %v2443_v41  ;;  %v1617_v40 = vmul.f32 %v1615_v33, %v2445_v56 }
 0xb3a   :  { %v1619_v35 = vstv %s1618_s19 }
 0xb3b   :  { %v1620_v42 = vmul.f32 %v1619_v35, %v1607_v22  ;;  %v1621_v29 = vmul.f32 %v1619_v35, %v1608_v31 }
 0xb3d   :  { %v1623_v44 = vadd.f32 %v1621_v29, %v1617_v40  ;;  %v1622_v36 = vadd.f32 %v1620_v42, %v1616_v37 }
 0xb79   :  { %v1984_v7 = vpop.f32.mrb[12].mxu1 }
 0xb7a   :  { %v1751_v46 = vadd.f32 %v1984_v7, %v1802_v45  ;;  %v1745_v47 = vpop.f32.mrb[13].mxu1 }
 0xb7b   :  { %v1746_v48 = vadd.f32 %v1802_v45, %v1745_v47 }
 0xb7c   :  { %v1755_v49 = vadd.f32 %v1751_v46, %v1623_v44 }
 0xb7d   :  { %v1754_v50 = vadd.f32 %v1746_v48, %v1622_v36 }
 0xb7e   :  { %1757 = vst.msk [vmem:[#allocation2 + $0x8] sm:$0xff] %vm52_vm0, %v1755_v49 }
 0xb7f   :  { %1756 = vst.msk [vmem:[#allocation2] sm:$0xff] %vm52_vm0, %v1754_v50 }
 0xb80   :  { %2107 = shalt.err (!%p2104_p7)
}
 0xb81   :  { %s2108_s24 = scalar_lea.hbm %s2484_s5, 256 }
 0xb82   :  { %p2109_p8 = scmp.ne.s32.totalorder %s2484_s5, %s2108_s24  ;;  %p2112_p9 = scmp.lt.u32.totalorder %s2108_s24, %s2484_s5 }
 0xb84   :  { %p2114_p10 = pnand %p2112_p9, %p2109_p8 }
 0xb86   :  { %2117 = shalt.err (!%p2114_p10)
}
 0xb87   :  { %s2126_s2 = smov 128   ;;  %s2127_s28 = smov 8  }
 0xb88   :  { %1769 = dma.vmem_to_hbm [thread:$0]  %s1764_s21, 256, %s2484_s5, [#allocation3], %s2126_s2, %s2126_s2, %s2127_s28  }
 0xb89   :  { %2118 = dma.done.wait [#allocation3], 256  }
 0xb8a   :  { %2119 = vsyncadd [#allocation3], 4294967040 }
 0xb8b   :  { %1773 = vsyncpa [#allocation3], 1 }

</bundles_post_ra>
